<compile_context>
chip_gen: v7x
topology: tpu7x:2x2x1
jax: 0.10.0
libtpu: 0.0.40
codegen_flags: <defaults>
</compile_context>

<pallas_src>
import functools

import jax
import jax.numpy as jnp
from jax.experimental import pallas as pl
from jax.experimental.pallas import tpu as pltpu


def _round_up(n, m):
    return ((n + m - 1) // m) * m


def _mll_kernel(x_ref, *refs, num_hidden_layers, compute_dtype):
    """One row-tile of the multi-linear stack.

    x_ref : (TM, H)         input rows (compute_dtype)
    wh_ref: (L-1, H, H)     hidden weights, (in, out) layout (compute_dtype)
    bh_ref: (L-1, 1, H)     hidden biases (f32)
    wo_ref: (H, Opad)       final weight, (in, out) layout (compute_dtype)
    bo_ref: (1, Opad)       final bias (f32)
    o_ref : (TM, Opad)      output rows
    """
    if num_hidden_layers > 0:
        wh_ref, bh_ref, wo_ref, bo_ref, o_ref = refs
    else:
        wo_ref, bo_ref, o_ref = refs

    h = x_ref[...]
    # Hidden layers: Linear(H, H) -> ReLU. num_hidden_layers is a static
    # Python int, so this unrolls at trace time.
    for i in range(num_hidden_layers):
        acc = jnp.dot(h, wh_ref[i], preferred_element_type=jnp.float32)
        acc = acc + bh_ref[i]                      # (1, H) f32 bias, sublane bcast
        h = jnp.maximum(acc, 0.0).astype(compute_dtype)   # ReLU in f32, cast down

    out = jnp.dot(h, wo_ref[...], preferred_element_type=jnp.float32) + bo_ref[...]
    o_ref[...] = out.astype(o_ref.dtype)


def multi_linear_layer(x, wh, bh, wo, bo, *, row_tile=256,
                       compute_dtype=jnp.bfloat16):
    """Apply the MultiLinearLayer forward pass with a Pallas TPU kernel.

    x : [..., H]      (any leading dims, flattened internally)
    wh: [L-1, H, H]   hidden weights, (in, out) layout
    bh: [L-1, H]      hidden biases
    wo: [H, O]        final weight, (in, out) layout
    bo: [O]           final bias
    """
    orig_shape = x.shape
    H = orig_shape[-1]
    O = wo.shape[-1]
    L1 = wh.shape[0]            # number of hidden (Linear+ReLU) blocks
    out_dtype = x.dtype

    x2 = x.reshape(-1, H)
    N = x2.shape[0]

    # --- row tiling: large tiles feed the MXU; clamp for small N -------------
    tm = min(row_tile, _round_up(max(N, 1), 8))
    Np = _round_up(N, tm)
    x2 = x2.astype(compute_dtype)
    if Np != N:
        x2 = jnp.pad(x2, ((0, Np - N), (0, 0)))

    # --- lane-dense output: pad final projection to a multiple of 128 --------
    Opad = _round_up(O, 128)
    wo_p = wo.astype(compute_dtype)
    bo_p = bo.astype(jnp.float32)
    if Opad != O:
        wo_p = jnp.pad(wo_p, ((0, 0), (0, Opad - O)))
        bo_p = jnp.pad(bo_p, ((0, Opad - O),))
    bo_p = bo_p.reshape(1, Opad)

    wh_p = wh.astype(compute_dtype)
    bh_p = bh.astype(jnp.float32).reshape(L1, 1, H) if L1 > 0 else None

    # --- VMEM budget (double-buffered x/out, worst-case weights) -------------
    cdt = jnp.dtype(compute_dtype).itemsize
    odt = jnp.dtype(out_dtype).itemsize
    est = (2 * tm * H * cdt + 2 * tm * Opad * odt
           + 2 * (L1 * H * H + H * Opad) * cdt
           + 2 * (L1 * H + Opad) * 4)
    vmem_limit = int(max(est + (8 << 20), 32 << 20))

    kernel = functools.partial(_mll_kernel, num_hidden_layers=L1,
                               compute_dtype=compute_dtype)
    grid = (Np // tm,)

    def build(weight_mode):
        def wspec(shape, imap):
            if weight_mode is None:
                return pl.BlockSpec(shape, imap)
            return pl.BlockSpec(shape, imap, pipeline_mode=weight_mode)

        in_specs = [pl.BlockSpec((tm, H), lambda i: (i, 0))]          # x rows
        args = [x2]
        if L1 > 0:
            in_specs += [wspec((L1, H, H), lambda i: (0, 0, 0)),       # hidden W
                         wspec((L1, 1, H), lambda i: (0, 0, 0))]       # hidden b
            args += [wh_p, bh_p]
        in_specs += [wspec((H, Opad), lambda i: (0, 0)),               # final W
                     wspec((1, Opad), lambda i: (0, 0))]               # final b
        args += [wo_p, bo_p]

        fn = pl.pallas_call(
            kernel,
            out_shape=jax.ShapeDtypeStruct((Np, Opad), out_dtype),
            grid_spec=pltpu.PrefetchScalarGridSpec(
                num_scalar_prefetch=0,
                grid=grid,
                in_specs=in_specs,
                out_specs=pl.BlockSpec((tm, Opad), lambda i: (i, 0)),
            ),
            compiler_params=pltpu.CompilerParams(
                dimension_semantics=("parallel",),
                vmem_limit_bytes=vmem_limit,
            ),
        )
        return fn, args

    # Weights/biases are grid-invariant: request single buffering so they are
    # not double-buffered in VMEM. Fall back to default buffering if the
    # installed Pallas version rejects Buffered(1).
    try:
        fn, args = build(pl.Buffered(1))
        out = fn(*args)
    except Exception:
        fn, args = build(None)
        out = fn(*args)

    out = out[:N, :O]
    return out.reshape(*orig_shape[:-1], O)


def init_params(key, layers, hidden_size, output_size, dtype=jnp.float32):
    """PyTorch-Linear-style init (uniform +/- 1/sqrt(fan_in)), weights stored
    in (in_features, out_features) layout."""
    num_hidden = layers - 1
    k_wh, k_bh, k_wo, k_bo = jax.random.split(key, 4)
    bound = 1.0 / (hidden_size ** 0.5)

    if num_hidden > 0:
        wh = jax.random.uniform(k_wh, (num_hidden, hidden_size, hidden_size),
                                dtype, -bound, bound)
        bh = jax.random.uniform(k_bh, (num_hidden, hidden_size),
                                dtype, -bound, bound)
    else:
        wh = jnp.zeros((0, hidden_size, hidden_size), dtype)
        bh = jnp.zeros((0, hidden_size), dtype)

    wo = jax.random.uniform(k_wo, (hidden_size, output_size), dtype, -bound, bound)
    bo = jax.random.uniform(k_bo, (output_size,), dtype, -bound, bound)
    return wh, bh, wo, bo


def reference_forward(x, wh, bh, wo, bo):
    """Pure-JAX f32 reference of the same forward pass."""
    h = x.astype(jnp.float32)
    for i in range(wh.shape[0]):
        h = jnp.maximum(h @ wh[i] + bh[i], 0.0)
    return (h @ wo + bo).astype(x.dtype)


if __name__ == "__main__":
    key = jax.random.PRNGKey(0)
    k_x, k_p = jax.random.split(key)

    # Small shapes consistent with the module: x = [batch, seq, hidden]
    batch, seq, hidden, output_size, layers = 2, 8, 32, 2, 3

    x = jax.random.normal(k_x, (batch, seq, hidden), jnp.float32)
    wh, bh, wo, bo = init_params(k_p, layers, hidden, output_size)

    ref = reference_forward(x.reshape(-1, hidden), wh, bh, wo, bo).reshape(
        batch, seq, output_size)

    # Exact path (f32 compute) -- must match reference tightly.
    out_f32 = jax.block_until_ready(
        multi_linear_layer(x, wh, bh, wo, bo, compute_dtype=jnp.float32))
    assert out_f32.shape == (batch, seq, output_size), out_f32.shape
    assert jnp.allclose(out_f32, ref, atol=1e-5, rtol=1e-5), "f32 mismatch"

    # Fast path (bf16 operands, f32 accumulation) -- bf16-level tolerance.
    out_bf16 = jax.block_until_ready(multi_linear_layer(x, wh, bh, wo, bo))
    assert out_bf16.shape == (batch, seq, output_size), out_bf16.shape
    assert jnp.allclose(out_bf16, ref, atol=5e-2, rtol=5e-2), "bf16 mismatch"

    # Edge case: layers == 1 (no hidden Linear+ReLU blocks).
    wh1, bh1, wo1, bo1 = init_params(k_p, 1, hidden, output_size)
    out1 = jax.block_until_ready(
        multi_linear_layer(x, wh1, bh1, wo1, bo1, compute_dtype=jnp.float32))
    ref1 = reference_forward(x.reshape(-1, hidden), wh1, bh1, wo1, bo1).reshape(
        batch, seq, output_size)
    assert jnp.allclose(out1, ref1, atol=1e-5, rtol=1e-5), "layers=1 mismatch"

    print("KERNEL_OK")
</pallas_src>

<mosaic_0001>
module attributes {stable_mosaic.version = 11 : i64} {
  func.func @_mll_kernel(%arg0: i32, %arg1: memref<16x32xf32, #tpu.memory_space<vmem>>, %arg2: memref<2x32x32xf32, #tpu.memory_space<vmem>>, %arg3: memref<2x1x32xf32, #tpu.memory_space<vmem>>, %arg4: memref<32x128xf32, #tpu.memory_space<vmem>>, %arg5: memref<1x128xf32, #tpu.memory_space<vmem>>, %arg6: memref<16x128xf32, #tpu.memory_space<vmem>>) attributes {dimension_semantics = [#tpu.dimension_semantics<parallel>], iteration_bounds = array<i64: 1>, scalar_prefetch = 0 : i64, scratch_operands = 0 : i64, tpu.core_type = #tpu.core_type<tc>, window_params = [{transform_indices = @transform_0, window_bounds = array<i64: 16, 32>}, {pipeline_mode = #tpu.pipeline_mode<synchronous>, transform_indices = @transform_1, window_bounds = array<i64: 2, 32, 32>}, {pipeline_mode = #tpu.pipeline_mode<synchronous>, transform_indices = @transform_2, window_bounds = array<i64: 2, 1, 32>}, {pipeline_mode = #tpu.pipeline_mode<synchronous>, transform_indices = @transform_3, window_bounds = array<i64: 32, 128>}, {pipeline_mode = #tpu.pipeline_mode<synchronous>, transform_indices = @transform_4, window_bounds = array<i64: 1, 128>}, {transform_indices = @transform_5, window_bounds = array<i64: 16, 128>}]} {
    %c0 = arith.constant 0 : index
    %c0_0 = arith.constant 0 : index
    %0 = vector.load %arg1[%c0, %c0_0] : memref<16x32xf32, #tpu.memory_space<vmem>>, vector<16x32xf32>
    %c0_1 = arith.constant 0 : index
    %c0_2 = arith.constant 0 : index
    %c0_3 = arith.constant 0 : index
    %1 = vector.load %arg2[%c0_1, %c0_2, %c0_3] : memref<2x32x32xf32, #tpu.memory_space<vmem>>, vector<1x32x32xf32>
    %2 = vector.shape_cast %1 : vector<1x32x32xf32> to vector<32x32xf32>
    %cst = arith.constant dense<0.000000e+00> : vector<16x32xf32>
    %3 = tpu.matmul %0, %2, %cst {dimension_numbers = #tpu.dot_dimension_numbers<[1], [0], [0], [1], [0, 0, 1, 1], [], []>} : vector<16x32xf32>, vector<32x32xf32>, vector<16x32xf32> -> vector<16x32xf32>
    %c0_4 = arith.constant 0 : index
    %c0_5 = arith.constant 0 : index
    %c0_6 = arith.constant 0 : index
    %4 = vector.load %arg3[%c0_4, %c0_5, %c0_6] : memref<2x1x32xf32, #tpu.memory_space<vmem>>, vector<1x1x32xf32>
    %5 = vector.shape_cast %4 : vector<1x1x32xf32> to vector<1x32xf32>
    %6 = vector.broadcast %5 : vector<1x32xf32> to vector<16x32xf32>
    %7 = arith.addf %3, %6 : vector<16x32xf32>
    %cst_7 = arith.constant 0.000000e+00 : f32
    %8 = vector.broadcast %cst_7 : f32 to vector<16x32xf32>
    %9 = arith.maximumf %7, %8 : vector<16x32xf32>
    %c1 = arith.constant 1 : index
    %c0_8 = arith.constant 0 : index
    %c0_9 = arith.constant 0 : index
    %10 = vector.load %arg2[%c1, %c0_8, %c0_9] : memref<2x32x32xf32, #tpu.memory_space<vmem>>, vector<1x32x32xf32>
    %11 = vector.shape_cast %10 : vector<1x32x32xf32> to vector<32x32xf32>
    %cst_10 = arith.constant dense<0.000000e+00> : vector<16x32xf32>
    %12 = tpu.matmul %9, %11, %cst_10 {dimension_numbers = #tpu.dot_dimension_numbers<[1], [0], [0], [1], [0, 0, 1, 1], [], []>} : vector<16x32xf32>, vector<32x32xf32>, vector<16x32xf32> -> vector<16x32xf32>
    %c1_11 = arith.constant 1 : index
    %c0_12 = arith.constant 0 : index
    %c0_13 = arith.constant 0 : index
    %13 = vector.load %arg3[%c1_11, %c0_12, %c0_13] : memref<2x1x32xf32, #tpu.memory_space<vmem>>, vector<1x1x32xf32>
    %14 = vector.shape_cast %13 : vector<1x1x32xf32> to vector<1x32xf32>
    %15 = vector.broadcast %14 : vector<1x32xf32> to vector<16x32xf32>
    %16 = arith.addf %12, %15 : vector<16x32xf32>
    %cst_14 = arith.constant 0.000000e+00 : f32
    %17 = vector.broadcast %cst_14 : f32 to vector<16x32xf32>
    %18 = arith.maximumf %16, %17 : vector<16x32xf32>
    %c0_15 = arith.constant 0 : index
    %c0_16 = arith.constant 0 : index
    %19 = vector.load %arg4[%c0_15, %c0_16] : memref<32x128xf32, #tpu.memory_space<vmem>>, vector<32x128xf32>
    %cst_17 = arith.constant dense<0.000000e+00> : vector<16x128xf32>
    %20 = tpu.matmul %18, %19, %cst_17 {dimension_numbers = #tpu.dot_dimension_numbers<[1], [0], [0], [1], [0, 0, 1, 1], [], []>} : vector<16x32xf32>, vector<32x128xf32>, vector<16x128xf32> -> vector<16x128xf32>
    %c0_18 = arith.constant 0 : index
    %c0_19 = arith.constant 0 : index
    %21 = vector.load %arg5[%c0_18, %c0_19] : memref<1x128xf32, #tpu.memory_space<vmem>>, vector<1x128xf32>
    %22 = vector.broadcast %21 : vector<1x128xf32> to vector<16x128xf32>
    %23 = arith.addf %20, %22 : vector<16x128xf32>
    %c0_20 = arith.constant 0 : index
    %c0_21 = arith.constant 0 : index
    %24 = vector.load %arg6[%c0_20, %c0_21] : memref<16x128xf32, #tpu.memory_space<vmem>>, vector<16x128xf32>
    tpu.vector_store %arg6[%c0_20, %c0_21], %23 {strides = array<i32>} : memref<16x128xf32, #tpu.memory_space<vmem>>, vector<16x128xf32>,
    return
  }
  func.func @transform_0(%arg0: i32) -> (i32, i32) {
    %c0_i32 = arith.constant 0 : i32
    %c0_i32_0 = arith.constant 0 : i32
    return %arg0, %c0_i32 : i32, i32
  }
  func.func @transform_1(%arg0: i32) -> (i32, i32, i32) {
    %c0_i32 = arith.constant 0 : i32
    %c0_i32_0 = arith.constant 0 : i32
    %c0_i32_1 = arith.constant 0 : i32
    %c0_i32_2 = arith.constant 0 : i32
    return %c0_i32, %c0_i32_0, %c0_i32_1 : i32, i32, i32
  }
  func.func @transform_2(%arg0: i32) -> (i32, i32, i32) {
    %c0_i32 = arith.constant 0 : i32
    %c0_i32_0 = arith.constant 0 : i32
    %c0_i32_1 = arith.constant 0 : i32
    %c0_i32_2 = arith.constant 0 : i32
    return %c0_i32, %c0_i32_0, %c0_i32_1 : i32, i32, i32
  }
  func.func @transform_3(%arg0: i32) -> (i32, i32) {
    %c0_i32 = arith.constant 0 : i32
    %c0_i32_0 = arith.constant 0 : i32
    %c0_i32_1 = arith.constant 0 : i32
    return %c0_i32, %c0_i32_0 : i32, i32
  }
  func.func @transform_4(%arg0: i32) -> (i32, i32) {
    %c0_i32 = arith.constant 0 : i32
    %c0_i32_0 = arith.constant 0 : i32
    %c0_i32_1 = arith.constant 0 : i32
    return %c0_i32, %c0_i32_0 : i32, i32
  }
  func.func @transform_5(%arg0: i32) -> (i32, i32) {
    %c0_i32 = arith.constant 0 : i32
    %c0_i32_0 = arith.constant 0 : i32
    return %arg0, %c0_i32 : i32, i32
  }
}

module attributes {stable_mosaic.version = 11 : i64} {
  func.func @_mll_kernel(%arg0: i32, %arg1: memref<16x32xf32, #tpu.memory_space<vmem>>, %arg2: memref<2x32x32xf32, #tpu.memory_space<vmem>>, %arg3: memref<2x1x32xf32, #tpu.memory_space<vmem>>, %arg4: memref<32x128xf32, #tpu.memory_space<vmem>>, %arg5: memref<1x128xf32, #tpu.memory_space<vmem>>, %arg6: memref<16x128xf32, #tpu.memory_space<vmem>>) attributes {dimension_semantics = [#tpu.dimension_semantics<parallel>], iteration_bounds = array<i64: 1>, scalar_prefetch = 0 : i64, scratch_operands = 0 : i64, tpu.core_type = #tpu.core_type<tc>, window_params = [{transform_indices = @transform_0, window_bounds = array<i64: 16, 32>}, {pipeline_mode = #tpu.pipeline_mode<synchronous>, transform_indices = @transform_1, window_bounds = array<i64: 2, 32, 32>}, {pipeline_mode = #tpu.pipeline_mode<synchronous>, transform_indices = @transform_2, window_bounds = array<i64: 2, 1, 32>}, {pipeline_mode = #tpu.pipeline_mode<synchronous>, transform_indices = @transform_3, window_bounds = array<i64: 32, 128>}, {pipeline_mode = #tpu.pipeline_mode<synchronous>, transform_indices = @transform_4, window_bounds = array<i64: 1, 128>}, {transform_indices = @transform_5, window_bounds = array<i64: 16, 128>}]} {
    %c0 = arith.constant 0 : index
    %c0_0 = arith.constant 0 : index
    %0 = vector.load %arg1[%c0, %c0_0] : memref<16x32xf32, #tpu.memory_space<vmem>>, vector<16x32xf32>
    %c0_1 = arith.constant 0 : index
    %c0_2 = arith.constant 0 : index
    %c0_3 = arith.constant 0 : index
    %1 = vector.load %arg2[%c0_1, %c0_2, %c0_3] : memref<2x32x32xf32, #tpu.memory_space<vmem>>, vector<1x32x32xf32>
    %2 = vector.shape_cast %1 : vector<1x32x32xf32> to vector<32x32xf32>
    %cst = arith.constant dense<0.000000e+00> : vector<16x32xf32>
    %3 = tpu.matmul %0, %2, %cst {dimension_numbers = #tpu.dot_dimension_numbers<[1], [0], [0], [1], [0, 0, 1, 1], [], []>} : vector<16x32xf32>, vector<32x32xf32>, vector<16x32xf32> -> vector<16x32xf32>
    %c0_4 = arith.constant 0 : index
    %c0_5 = arith.constant 0 : index
    %c0_6 = arith.constant 0 : index
    %4 = vector.load %arg3[%c0_4, %c0_5, %c0_6] : memref<2x1x32xf32, #tpu.memory_space<vmem>>, vector<1x1x32xf32>
    %5 = vector.shape_cast %4 : vector<1x1x32xf32> to vector<1x32xf32>
    %6 = vector.broadcast %5 : vector<1x32xf32> to vector<16x32xf32>
    %7 = arith.addf %3, %6 : vector<16x32xf32>
    %cst_7 = arith.constant 0.000000e+00 : f32
    %8 = vector.broadcast %cst_7 : f32 to vector<16x32xf32>
    %9 = arith.maximumf %7, %8 : vector<16x32xf32>
    %c1 = arith.constant 1 : index
    %c0_8 = arith.constant 0 : index
    %c0_9 = arith.constant 0 : index
    %10 = vector.load %arg2[%c1, %c0_8, %c0_9] : memref<2x32x32xf32, #tpu.memory_space<vmem>>, vector<1x32x32xf32>
    %11 = vector.shape_cast %10 : vector<1x32x32xf32> to vector<32x32xf32>
    %cst_10 = arith.constant dense<0.000000e+00> : vector<16x32xf32>
    %12 = tpu.matmul %9, %11, %cst_10 {dimension_numbers = #tpu.dot_dimension_numbers<[1], [0], [0], [1], [0, 0, 1, 1], [], []>} : vector<16x32xf32>, vector<32x32xf32>, vector<16x32xf32> -> vector<16x32xf32>
    %c1_11 = arith.constant 1 : index
    %c0_12 = arith.constant 0 : index
    %c0_13 = arith.constant 0 : index
    %13 = vector.load %arg3[%c1_11, %c0_12, %c0_13] : memref<2x1x32xf32, #tpu.memory_space<vmem>>, vector<1x1x32xf32>
    %14 = vector.shape_cast %13 : vector<1x1x32xf32> to vector<1x32xf32>
    %15 = vector.broadcast %14 : vector<1x32xf32> to vector<16x32xf32>
    %16 = arith.addf %12, %15 : vector<16x32xf32>
    %cst_14 = arith.constant 0.000000e+00 : f32
    %17 = vector.broadcast %cst_14 : f32 to vector<16x32xf32>
    %18 = arith.maximumf %16, %17 : vector<16x32xf32>
    %c0_15 = arith.constant 0 : index
    %c0_16 = arith.constant 0 : index
    %19 = vector.load %arg4[%c0_15, %c0_16] : memref<32x128xf32, #tpu.memory_space<vmem>>, vector<32x128xf32>
    %cst_17 = arith.constant dense<0.000000e+00> : vector<16x128xf32>
    %20 = tpu.matmul %18, %19, %cst_17 {dimension_numbers = #tpu.dot_dimension_numbers<[1], [0], [0], [1], [0, 0, 1, 1], [], []>} : vector<16x32xf32>, vector<32x128xf32>, vector<16x128xf32> -> vector<16x128xf32>
    %c0_18 = arith.constant 0 : index
    %c0_19 = arith.constant 0 : index
    %21 = vector.load %arg5[%c0_18, %c0_19] : memref<1x128xf32, #tpu.memory_space<vmem>>, vector<1x128xf32>
    %22 = vector.broadcast %21 : vector<1x128xf32> to vector<16x128xf32>
    %23 = arith.addf %20, %22 : vector<16x128xf32>
    %c0_20 = arith.constant 0 : index
    %c0_21 = arith.constant 0 : index
    %24 = vector.load %arg6[%c0_20, %c0_21] : memref<16x128xf32, #tpu.memory_space<vmem>>, vector<16x128xf32>
    tpu.vector_store %arg6[%c0_20, %c0_21], %23 {strides = array<i32>} : memref<16x128xf32, #tpu.memory_space<vmem>>, vector<16x128xf32>,
    return
  }
  func.func @transform_0(%arg0: i32) -> (i32, i32) {
    %c0_i32 = arith.constant 0 : i32
    %c0_i32_0 = arith.constant 0 : i32
    return %arg0, %c0_i32 : i32, i32
  }
  func.func @transform_1(%arg0: i32) -> (i32, i32, i32) {
    %c0_i32 = arith.constant 0 : i32
    %c0_i32_0 = arith.constant 0 : i32
    %c0_i32_1 = arith.constant 0 : i32
    %c0_i32_2 = arith.constant 0 : i32
    return %c0_i32, %c0_i32_0, %c0_i32_1 : i32, i32, i32
  }
  func.func @transform_2(%arg0: i32) -> (i32, i32, i32) {
    %c0_i32 = arith.constant 0 : i32
    %c0_i32_0 = arith.constant 0 : i32
    %c0_i32_1 = arith.constant 0 : i32
    %c0_i32_2 = arith.constant 0 : i32
    return %c0_i32, %c0_i32_0, %c0_i32_1 : i32, i32, i32
  }
  func.func @transform_3(%arg0: i32) -> (i32, i32) {
    %c0_i32 = arith.constant 0 : i32
    %c0_i32_0 = arith.constant 0 : i32
    %c0_i32_1 = arith.constant 0 : i32
    return %c0_i32, %c0_i32_0 : i32, i32
  }
  func.func @transform_4(%arg0: i32) -> (i32, i32) {
    %c0_i32 = arith.constant 0 : i32
    %c0_i32_0 = arith.constant 0 : i32
    %c0_i32_1 = arith.constant 0 : i32
    return %c0_i32, %c0_i32_0 : i32, i32
  }
  func.func @transform_5(%arg0: i32) -> (i32, i32) {
    %c0_i32 = arith.constant 0 : i32
    %c0_i32_0 = arith.constant 0 : i32
    return %arg0, %c0_i32 : i32, i32
  }
}

</mosaic_0001>

<bundles_post_ra>
// kernel: tpu_custom_call.1
= control target key start
LH: loop header
LB: loop body
LE: loop exit
PB: predicated region body
PF: predicated region fallthrough
CT: control target
= control target key end

     0   :  { %10 = vsyncpa [#allocation3], 0  ;;  %s670_s0 = inlined_call_operand.hbm [shape: f32[16,32], index: 0, kind: input, shape index: {}]   ;;  %s671_s1 = inlined_call_operand.hbm [shape: f32[2,32,32], index: 1, kind: input, shape index: {}]   ;;  %s672_s2 = inlined_call_operand.vmem [shape: f32[2,1,32], index: 2, kind: input, shape index: {}]   ;;  %s673_s3 = inlined_call_operand.hbm [shape: f32[32,128], index: 3, kind: input, shape index: {}]   ;;  %s674_s4 = inlined_call_operand.vmem [shape: f32[1,128], index: 4, kind: input, shape index: {}]   ;;  %s675_s5 = inlined_call_operand.hbm [shape: f32[16,128], index: 5, kind: output, shape index: {}]  }
   0x1   :  { %11 = vsyncpa [#allocation6], 0 }
   0x2   :  { %12 = vsyncpa [#allocation4], 0  ;;  %s552_s18 = smov [#allocation5]   ;;  %s553_s20 = smov [#allocation2]  }
   0x3   :  { %s30_s19 = sshll.u32 %s552_s18, 4  ;;  %s18_s21 = sshll.u32 %s553_s20, 4  ;;  %s31_s19 = int_to_ptr.vmem [resolvable:$true] %s30_s19  ;;  %s588_s21 = int_to_ptr.vmem [resolvable:$true] %s18_s21 }
   0x4   :  { %s458_s24 = scalar_lea.hbm %s671_s1, 1024 }
   0x5   :  { %p459_p0 = scmp.ne.s32.totalorder %s671_s1, %s458_s24  ;;  %p462_p1 = scmp.lt.u32.totalorder %s458_s24, %s671_s1 }
   0x7   :  { %p464_p2 = pnand %p462_p1, %p459_p0 }
   0x9   :  { %467 = shalt.err (!%p464_p2)
}
   0xa   :  { %s468_s29 = scalar_lea.vmem %s31_s19, 1024  ;;  %p473_p4 = scmp.lt.s32.totalorder %s31_s19, %s31_s19 }
   0xb   :  { %p469_p3 = scmp.ne.s32.totalorder %s31_s19, %s468_s29  ;;  %p474_p5 = scmp.lt.s32.totalorder %s468_s29, %s468_s29 }
   0xd   :  { %p475_p6 = por %p474_p5, %p473_p4 }
   0xf   :  { %p476_p7 = pnand %p475_p6, %p469_p3 }
  0x11   :  { %479 = shalt.err (!%p476_p7)
}
  0x12   :  { %s554_s30 = smov 128   ;;  %s555_s6 = smov 8  }
  0x13   :  { %36 = dma.hbm_to_vmem [thread:$0]  %s671_s1, 1024, %s31_s19, [#allocation6], %s554_s30, %s554_s30, %s555_s6  }
  0x14   :  { %s480_s11 = scalar_lea.hbm %s670_s0, 256 }
  0x15   :  { %p481_p8 = scmp.ne.s32.totalorder %s670_s0, %s480_s11  ;;  %p484_p9 = scmp.lt.u32.totalorder %s480_s11, %s670_s0 }
  0x17   :  { %p486_p10 = pnand %p484_p9, %p481_p8 }
  0x19   :  { %489 = shalt.err (!%p486_p10)
}
  0x1a   :  { %s490_s16 = scalar_lea.vmem %s588_s21, 256  ;;  %p495_p12 = scmp.lt.s32.totalorder %s588_s21, %s588_s21 }
  0x1b   :  { %p491_p11 = scmp.ne.s32.totalorder %s588_s21, %s490_s16  ;;  %p496_p13 = scmp.lt.s32.totalorder %s490_s16, %s490_s16 }
  0x1d   :  { %p497_p0 = por %p496_p13, %p495_p12 }
  0x1f   :  { %p498_p1 = pnand %p497_p0, %p491_p11 }
  0x21   :  { %501 = shalt.err (!%p498_p1)
}
  0x22   :  { %24 = dma.hbm_to_vmem [thread:$0]  %s670_s0, 256, %s588_s21, [#allocation3], %s554_s30, %s554_s30, %s555_s6  }
  0x23   :  { %s556_s18 = smov [#allocation7]   ;;  %s502_s23 = scalar_lea.hbm %s673_s3, 512 }
  0x24   :  { %s44_s19 = sshll.u32 %s556_s18, 4  ;;  %p503_p2 = scmp.ne.s32.totalorder %s673_s3, %s502_s23  ;;  %s45_s19 = int_to_ptr.vmem [resolvable:$true] %s44_s19 }
  0x25   :  { %p506_p3 = scmp.lt.u32.totalorder %s502_s23, %s673_s3 }
  0x27   :  { %p508_p4 = pnand %p506_p3, %p503_p2 }
  0x29   :  { %511 = shalt.err (!%p508_p4)
}
  0x2a   :  { %s512_s28 = scalar_lea.vmem %s45_s19, 512  ;;  %p517_p6 = scmp.lt.s32.totalorder %s45_s19, %s45_s19 }
  0x2b   :  { %p513_p5 = scmp.ne.s32.totalorder %s45_s19, %s512_s28  ;;  %p518_p7 = scmp.lt.s32.totalorder %s512_s28, %s512_s28 }
  0x2d   :  { %p519_p8 = por %p518_p7, %p517_p6 }
  0x2f   :  { %p520_p9 = pnand %p519_p8, %p513_p5 }
  0x31   :  { %523 = shalt.err (!%p520_p9)
}
  0x32   :  { %50 = dma.hbm_to_vmem [thread:$0]  %s673_s3, 512, %s45_s19, [#allocation6], %s554_s30, %s554_s30, %s555_s6  }
  0x33   :  { %546 = dma.done.wait [#allocation3], 256  }
  0x34   :  { %547 = vsyncadd [#allocation3], 4294967040 }
  0x35   :  { %548 = dma.done.wait [#allocation6], 1536  }
  0x36   :  { %549 = vsyncadd [#allocation6], 4294965760  ;;  %vm75_vm0 = vcmask 261120   ;;  %v64_v0 = vld [vmem:[#allocation5] sm:$0xff]  ;;  %v65_v1 = vld [vmem:[#allocation5 + $0x8] sm:$0xff]  ;;  %s557_s11 = smov [#allocation8]  }
  0x37   :  { %v66_v2 = vld [vmem:[#allocation5 + $0x10] sm:$0xff]  ;;  %v428_v3 = vpack.c.bf16 %v65_v1, %v64_v0  ;;  %v67_v4 = vld [vmem:[#allocation5 + $0x18] sm:$0xff]  ;;  %v160_v7 = vld [vmem:[#allocation5 + $0x20] sm:$0xff]  ;;  %s354_s12 = sshll.u32 %s557_s11, 4  ;;  %s355_s12 = int_to_ptr.vmem [resolvable:$true] %s354_s12 }
  0x38   :  { %v62_v5 = vld [vmem:[#allocation2] sm:$0xff]  ;;  %v432_v6 = vpack.c.bf16 %v67_v4, %v66_v2  ;;  %v161_v8 = vld [vmem:[#allocation5 + $0x28] sm:$0xff]  ;;  %v63_v10 = vld [vmem:[#allocation2 + $0x8] sm:$0xff]  ;;  %p529_p11 = scmp.lt.s32.totalorder %s355_s12, %s355_s12 }
  0x39   :  { %403 = vmatprep.mubr.msk.f32.mxu0 %vm75_vm0, %v62_v5  ;;  %429 = vmatprep.subr.bf16.mxu0 %v428_v3  ;;  %v436_v9 = vpack.c.bf16 %v161_v8, %v160_v7  ;;  %v162_v11 = vld [vmem:[#allocation5 + $0x30] sm:$0xff]  ;;  %v163_v12 = vld [vmem:[#allocation5 + $0x38] sm:$0xff]  ;;  %v255_v14 = vld [vmem:[#allocation7] sm:$0xff] }
  0x3a   :  { %431 = vmatpush3.bf16.msra.mxu0 %v428_v3  ;;  %v440_v13 = vpack.c.bf16 %v163_v12, %v162_v11  ;;  %v256_v15 = vld [vmem:[#allocation7 + $0x8] sm:$0xff]  ;;  %v367_v17 = vld [vmem:[%s672_s2] ss:$0 sm:$0xff]  ;;  %v258_v25 = vld [vmem:[#allocation7 + $0x18] sm:$0xff] }
  0x3b   :  { %433 = vmatprep.subr.bf16.mxu0 %v432_v6  ;;  %437 = vmatprep.subr.bf16.mxu1 %v436_v9  ;;  %v444_v16 = vpack.c.bf16 %v256_v15, %v255_v14  ;;  %v257_v24 = vld [vmem:[#allocation7 + $0x10] sm:$0xff] }
  0x3c   :  { %439 = vmatpush3.bf16.msra.mxu1 %v436_v9  ;;  %v448_v26 = vpack.c.bf16 %v258_v25, %v257_v24  ;;  %v371_v27 = vld [vmem:[%s672_s2 + $0x1] ss:$0 sm:$0xff]  ;;  %v374_v34 = vld [vmem:[%s674_s4] ss:$0 sm:$0xff]  ;;  %s524_s2 = scalar_lea.vmem %s355_s12, 256 }
  0x3d   :  { %441 = vmatprep.subr.bf16.mxu1 %v440_v13  ;;  %p525_p10 = scmp.ne.s32.totalorder %s355_s12, %s524_s2  ;;  %p530_p12 = scmp.lt.s32.totalorder %s524_s2, %s524_s2 }
  0x3e   :  { %435 = vmatpush3.bf16.msra.mxu0 %v432_v6 }
  0x3f   :  { %445 = vmatprep.subr.bf16.mxu0 %v444_v16  ;;  %p531_p13 = por %p530_p12, %p529_p11 }
  0x40   :  { %443 = vmatpush3.bf16.msra.mxu1 %v440_v13 }
  0x41   :  { %404 = vmatmul.mubr.msk.f32.vlgmr.msra.gmra.mrb[0].mxu0 %vm75_vm0, %v63_v10  ;;  %p532_p0 = pnand %p531_p13, %p525_p10 }
  0x42   :  { %447 = vmatpush3.bf16.msra.mxu0 %v444_v16 }
  0x43   :  { %449 = vmatprep.subr.bf16.mxu0 %v448_v26 }
  0x46   :  { %451 = vmatpush3.bf16.msra.mxu0 %v448_v26 }
 0x114   :  { %v405_v18 = vpop.f32.mrb[0].mxu0 }
 0x115   :  { %v154_v19 = vadd.f32 %v405_v18, %v367_v17  ;;  %v148_v20 = vpop.f32.mrb[1].mxu0 }
 0x116   :  { %v149_v21 = vadd.f32 %v367_v17, %v148_v20 }
 0x117   :  { %v158_v23 = vmax.f32 %v154_v19, 0.0 }
 0x118   :  { %v157_v22 = vmax.f32 %v149_v21, 0.0 }
 0x11a   :  { %414 = vmatprep.mubr.msk.f32.mxu1 %vm75_vm0, %v157_v22 }
 0x11b   :  { %415 = vmatmul.mubr.msk.f32.vlgmr.msra.gmra.mrb[0].mxu1 %vm75_vm0, %v158_v23 }
 0x1ee   :  { %v416_v28 = vpop.f32.mrb[0].mxu1 }
 0x1ef   :  { %v250_v29 = vadd.f32 %v416_v28, %v371_v27  ;;  %v244_v30 = vpop.f32.mrb[1].mxu1 }
 0x1f0   :  { %v245_v31 = vadd.f32 %v371_v27, %v244_v30 }
 0x1f1   :  { %v254_v33 = vmax.f32 %v250_v29, 0.0 }
 0x1f2   :  { %v253_v32 = vmax.f32 %v245_v31, 0.0 }
 0x1f4   :  { %425 = vmatprep.mubr.msk.f32.mxu0 %vm75_vm0, %v253_v32 }
 0x1f5   :  { %426 = vmatmul.mubr.msk.f32.vlgmr.msra.gmra.mrb[2].mxu0 %vm75_vm0, %v254_v33 }
 0x2c8   :  { %v427_v35 = vpop.f32.mrb[2].mxu0 }
 0x2c9   :  { %v344_v36 = vadd.f32 %v427_v35, %v374_v34  ;;  %v338_v37 = vpop.f32.mrb[3].mxu0 }
 0x2ca   :  { %v339_v38 = vadd.f32 %v374_v34, %v338_v37 }
 0x2cb   :  { %348 = vst [vmem:[#allocation8 + $0x8] sm:$0xff] %v344_v36 }
 0x2cc   :  { %347 = vst [vmem:[#allocation8] sm:$0xff] %v339_v38 }
 0x2cd   :  { %535 = shalt.err (!%p532_p0)
}
 0x2ce   :  { %s536_s4 = scalar_lea.hbm %s675_s5, 256 }
 0x2cf   :  { %p537_p1 = scmp.ne.s32.totalorder %s675_s5, %s536_s4  ;;  %p540_p2 = scmp.lt.u32.totalorder %s536_s4, %s675_s5 }
 0x2d1   :  { %p542_p3 = pnand %p540_p2, %p537_p1 }
 0x2d3   :  { %545 = shalt.err (!%p542_p3)
}
 0x2d4   :  { %360 = dma.vmem_to_hbm [thread:$0]  %s355_s12, 256, %s675_s5, [#allocation4], %s554_s30, %s554_s30, %s555_s6  }
 0x2d5   :  { %550 = dma.done.wait [#allocation4], 256  }
 0x2d6   :  { %551 = vsyncadd [#allocation4], 4294967040 }
 0x2d7   :  { %364 = vsyncpa [#allocation3], 1 }
 0x2d8   :  { %365 = vsyncpa [#allocation6], 1 }
 0x2d9   :  { %366 = vsyncpa [#allocation4], 1 }

// kernel: tpu_custom_call.1
= control target key start
LH: loop header
LB: loop body
LE: loop exit
PB: predicated region body
PF: predicated region fallthrough
CT: control target
= control target key end

     0   :  { %10 = vsyncpa [#allocation3], 0  ;;  %s670_s0 = inlined_call_operand.hbm [shape: f32[16,32], index: 0, kind: input, shape index: {}]   ;;  %s671_s1 = inlined_call_operand.hbm [shape: f32[2,32,32], index: 1, kind: input, shape index: {}]   ;;  %s672_s2 = inlined_call_operand.vmem [shape: f32[2,1,32], index: 2, kind: input, shape index: {}]   ;;  %s673_s3 = inlined_call_operand.hbm [shape: f32[32,128], index: 3, kind: input, shape index: {}]   ;;  %s674_s4 = inlined_call_operand.vmem [shape: f32[1,128], index: 4, kind: input, shape index: {}]   ;;  %s675_s5 = inlined_call_operand.hbm [shape: f32[16,128], index: 5, kind: output, shape index: {}]  }
   0x1   :  { %11 = vsyncpa [#allocation6], 0 }
   0x2   :  { %12 = vsyncpa [#allocation4], 0  ;;  %s552_s18 = smov [#allocation5]   ;;  %s553_s20 = smov [#allocation2]  }
   0x3   :  { %s30_s19 = sshll.u32 %s552_s18, 4  ;;  %s18_s21 = sshll.u32 %s553_s20, 4  ;;  %s31_s19 = int_to_ptr.vmem [resolvable:$true] %s30_s19  ;;  %s588_s21 = int_to_ptr.vmem [resolvable:$true] %s18_s21 }
   0x4   :  { %s458_s24 = scalar_lea.hbm %s671_s1, 1024 }
   0x5   :  { %p459_p0 = scmp.ne.s32.totalorder %s671_s1, %s458_s24  ;;  %p462_p1 = scmp.lt.u32.totalorder %s458_s24, %s671_s1 }
   0x7   :  { %p464_p2 = pnand %p462_p1, %p459_p0 }
   0x9   :  { %467 = shalt.err (!%p464_p2)
}
   0xa   :  { %s468_s29 = scalar_lea.vmem %s31_s19, 1024  ;;  %p473_p4 = scmp.lt.s32.totalorder %s31_s19, %s31_s19 }
   0xb   :  { %p469_p3 = scmp.ne.s32.totalorder %s31_s19, %s468_s29  ;;  %p474_p5 = scmp.lt.s32.totalorder %s468_s29, %s468_s29 }
   0xd   :  { %p475_p6 = por %p474_p5, %p473_p4 }
   0xf   :  { %p476_p7 = pnand %p475_p6, %p469_p3 }
  0x11   :  { %479 = shalt.err (!%p476_p7)
}
  0x12   :  { %s554_s30 = smov 128   ;;  %s555_s6 = smov 8  }
  0x13   :  { %36 = dma.hbm_to_vmem [thread:$0]  %s671_s1, 1024, %s31_s19, [#allocation6], %s554_s30, %s554_s30, %s555_s6  }
  0x14   :  { %s480_s11 = scalar_lea.hbm %s670_s0, 256 }
  0x15   :  { %p481_p8 = scmp.ne.s32.totalorder %s670_s0, %s480_s11  ;;  %p484_p9 = scmp.lt.u32.totalorder %s480_s11, %s670_s0 }
  0x17   :  { %p486_p10 = pnand %p484_p9, %p481_p8 }
  0x19   :  { %489 = shalt.err (!%p486_p10)
}
  0x1a   :  { %s490_s16 = scalar_lea.vmem %s588_s21, 256  ;;  %p495_p12 = scmp.lt.s32.totalorder %s588_s21, %s588_s21 }
  0x1b   :  { %p491_p11 = scmp.ne.s32.totalorder %s588_s21, %s490_s16  ;;  %p496_p13 = scmp.lt.s32.totalorder %s490_s16, %s490_s16 }
  0x1d   :  { %p497_p0 = por %p496_p13, %p495_p12 }
  0x1f   :  { %p498_p1 = pnand %p497_p0, %p491_p11 }
  0x21   :  { %501 = shalt.err (!%p498_p1)
}
  0x22   :  { %24 = dma.hbm_to_vmem [thread:$0]  %s670_s0, 256, %s588_s21, [#allocation3], %s554_s30, %s554_s30, %s555_s6  }
  0x23   :  { %s556_s18 = smov [#allocation7]   ;;  %s502_s23 = scalar_lea.hbm %s673_s3, 512 }
  0x24   :  { %s44_s19 = sshll.u32 %s556_s18, 4  ;;  %p503_p2 = scmp.ne.s32.totalorder %s673_s3, %s502_s23  ;;  %s45_s19 = int_to_ptr.vmem [resolvable:$true] %s44_s19 }
  0x25   :  { %p506_p3 = scmp.lt.u32.totalorder %s502_s23, %s673_s3 }
  0x27   :  { %p508_p4 = pnand %p506_p3, %p503_p2 }
  0x29   :  { %511 = shalt.err (!%p508_p4)
}
  0x2a   :  { %s512_s28 = scalar_lea.vmem %s45_s19, 512  ;;  %p517_p6 = scmp.lt.s32.totalorder %s45_s19, %s45_s19 }
  0x2b   :  { %p513_p5 = scmp.ne.s32.totalorder %s45_s19, %s512_s28  ;;  %p518_p7 = scmp.lt.s32.totalorder %s512_s28, %s512_s28 }
  0x2d   :  { %p519_p8 = por %p518_p7, %p517_p6 }
  0x2f   :  { %p520_p9 = pnand %p519_p8, %p513_p5 }
  0x31   :  { %523 = shalt.err (!%p520_p9)
}
  0x32   :  { %50 = dma.hbm_to_vmem [thread:$0]  %s673_s3, 512, %s45_s19, [#allocation6], %s554_s30, %s554_s30, %s555_s6  }
  0x33   :  { %546 = dma.done.wait [#allocation3], 256  }
  0x34   :  { %547 = vsyncadd [#allocation3], 4294967040 }
  0x35   :  { %548 = dma.done.wait [#allocation6], 1536  }
  0x36   :  { %549 = vsyncadd [#allocation6], 4294965760  ;;  %vm75_vm0 = vcmask 261120   ;;  %v64_v0 = vld [vmem:[#allocation5] sm:$0xff]  ;;  %v65_v1 = vld [vmem:[#allocation5 + $0x8] sm:$0xff]  ;;  %s557_s11 = smov [#allocation8]  }
  0x37   :  { %v66_v2 = vld [vmem:[#allocation5 + $0x10] sm:$0xff]  ;;  %v428_v3 = vpack.c.bf16 %v65_v1, %v64_v0  ;;  %v67_v4 = vld [vmem:[#allocation5 + $0x18] sm:$0xff]  ;;  %v160_v7 = vld [vmem:[#allocation5 + $0x20] sm:$0xff]  ;;  %s354_s12 = sshll.u32 %s557_s11, 4  ;;  %s355_s12 = int_to_ptr.vmem [resolvable:$true] %s354_s12 }
  0x38   :  { %v62_v5 = vld [vmem:[#allocation2] sm:$0xff]  ;;  %v432_v6 = vpack.c.bf16 %v67_v4, %v66_v2  ;;  %v161_v8 = vld [vmem:[#allocation5 + $0x28] sm:$0xff]  ;;  %v63_v10 = vld [vmem:[#allocation2 + $0x8] sm:$0xff]  ;;  %p529_p11 = scmp.lt.s32.totalorder %s355_s12, %s355_s12 }
  0x39   :  { %403 = vmatprep.mubr.msk.f32.mxu0 %vm75_vm0, %v62_v5  ;;  %429 = vmatprep.subr.bf16.mxu0 %v428_v3  ;;  %v436_v9 = vpack.c.bf16 %v161_v8, %v160_v7  ;;  %v162_v11 = vld [vmem:[#allocation5 + $0x30] sm:$0xff]  ;;  %v163_v12 = vld [vmem:[#allocation5 + $0x38] sm:$0xff]  ;;  %v255_v14 = vld [vmem:[#allocation7] sm:$0xff] }
  0x3a   :  { %431 = vmatpush3.bf16.msra.mxu0 %v428_v3  ;;  %v440_v13 = vpack.c.bf16 %v163_v12, %v162_v11  ;;  %v256_v15 = vld [vmem:[#allocation7 + $0x8] sm:$0xff]  ;;  %v367_v17 = vld [vmem:[%s672_s2] ss:$0 sm:$0xff]  ;;  %v258_v25 = vld [vmem:[#allocation7 + $0x18] sm:$0xff] }
  0x3b   :  { %433 = vmatprep.subr.bf16.mxu0 %v432_v6  ;;  %437 = vmatprep.subr.bf16.mxu1 %v436_v9  ;;  %v444_v16 = vpack.c.bf16 %v256_v15, %v255_v14  ;;  %v257_v24 = vld [vmem:[#allocation7 + $0x10] sm:$0xff] }
  0x3c   :  { %439 = vmatpush3.bf16.msra.mxu1 %v436_v9  ;;  %v448_v26 = vpack.c.bf16 %v258_v25, %v257_v24  ;;  %v371_v27 = vld [vmem:[%s672_s2 + $0x1] ss:$0 sm:$0xff]  ;;  %v374_v34 = vld [vmem:[%s674_s4] ss:$0 sm:$0xff]  ;;  %s524_s2 = scalar_lea.vmem %s355_s12, 256 }
  0x3d   :  { %441 = vmatprep.subr.bf16.mxu1 %v440_v13  ;;  %p525_p10 = scmp.ne.s32.totalorder %s355_s12, %s524_s2  ;;  %p530_p12 = scmp.lt.s32.totalorder %s524_s2, %s524_s2 }
  0x3e   :  { %435 = vmatpush3.bf16.msra.mxu0 %v432_v6 }
  0x3f   :  { %445 = vmatprep.subr.bf16.mxu0 %v444_v16  ;;  %p531_p13 = por %p530_p12, %p529_p11 }
  0x40   :  { %443 = vmatpush3.bf16.msra.mxu1 %v440_v13 }
  0x41   :  { %404 = vmatmul.mubr.msk.f32.vlgmr.msra.gmra.mrb[0].mxu0 %vm75_vm0, %v63_v10  ;;  %p532_p0 = pnand %p531_p13, %p525_p10 }
  0x42   :  { %447 = vmatpush3.bf16.msra.mxu0 %v444_v16 }
  0x43   :  { %449 = vmatprep.subr.bf16.mxu0 %v448_v26 }
  0x46   :  { %451 = vmatpush3.bf16.msra.mxu0 %v448_v26 }
 0x114   :  { %v405_v18 = vpop.f32.mrb[0].mxu0 }
 0x115   :  { %v154_v19 = vadd.f32 %v405_v18, %v367_v17  ;;  %v148_v20 = vpop.f32.mrb[1].mxu0 }
 0x116   :  { %v149_v21 = vadd.f32 %v367_v17, %v148_v20 }
 0x117   :  { %v158_v23 = vmax.f32 %v154_v19, 0.0 }
 0x118   :  { %v157_v22 = vmax.f32 %v149_v21, 0.0 }
 0x11a   :  { %414 = vmatprep.mubr.msk.f32.mxu1 %vm75_vm0, %v157_v22 }
 0x11b   :  { %415 = vmatmul.mubr.msk.f32.vlgmr.msra.gmra.mrb[0].mxu1 %vm75_vm0, %v158_v23 }
 0x1ee   :  { %v416_v28 = vpop.f32.mrb[0].mxu1 }
 0x1ef   :  { %v250_v29 = vadd.f32 %v416_v28, %v371_v27  ;;  %v244_v30 = vpop.f32.mrb[1].mxu1 }
 0x1f0   :  { %v245_v31 = vadd.f32 %v371_v27, %v244_v30 }
 0x1f1   :  { %v254_v33 = vmax.f32 %v250_v29, 0.0 }
 0x1f2   :  { %v253_v32 = vmax.f32 %v245_v31, 0.0 }
 0x1f4   :  { %425 = vmatprep.mubr.msk.f32.mxu0 %vm75_vm0, %v253_v32 }
 0x1f5   :  { %426 = vmatmul.mubr.msk.f32.vlgmr.msra.gmra.mrb[2].mxu0 %vm75_vm0, %v254_v33 }
 0x2c8   :  { %v427_v35 = vpop.f32.mrb[2].mxu0 }
 0x2c9   :  { %v344_v36 = vadd.f32 %v427_v35, %v374_v34  ;;  %v338_v37 = vpop.f32.mrb[3].mxu0 }
 0x2ca   :  { %v339_v38 = vadd.f32 %v374_v34, %v338_v37 }
 0x2cb   :  { %348 = vst [vmem:[#allocation8 + $0x8] sm:$0xff] %v344_v36 }
 0x2cc   :  { %347 = vst [vmem:[#allocation8] sm:$0xff] %v339_v38 }
 0x2cd   :  { %535 = shalt.err (!%p532_p0)
}
 0x2ce   :  { %s536_s4 = scalar_lea.hbm %s675_s5, 256 }
 0x2cf   :  { %p537_p1 = scmp.ne.s32.totalorder %s675_s5, %s536_s4  ;;  %p540_p2 = scmp.lt.u32.totalorder %s536_s4, %s675_s5 }
 0x2d1   :  { %p542_p3 = pnand %p540_p2, %p537_p1 }
 0x2d3   :  { %545 = shalt.err (!%p542_p3)
}
 0x2d4   :  { %360 = dma.vmem_to_hbm [thread:$0]  %s355_s12, 256, %s675_s5, [#allocation4], %s554_s30, %s554_s30, %s555_s6  }
 0x2d5   :  { %550 = dma.done.wait [#allocation4], 256  }
 0x2d6   :  { %551 = vsyncadd [#allocation4], 4294967040 }
 0x2d7   :  { %364 = vsyncpa [#allocation3], 1 }
 0x2d8   :  { %365 = vsyncpa [#allocation6], 1 }
 0x2d9   :  { %366 = vsyncpa [#allocation4], 1 }

</bundles_post_ra>
